<compile_context>
chip_gen: v7x
topology: tpu7x:2x2x1
jax: 0.10.0
libtpu: 0.0.40
codegen_flags: <defaults>
</compile_context>

<pallas_src>
import functools

import jax
import jax.numpy as jnp
from jax.experimental import pallas as pl
from jax.experimental.pallas import tpu as pltpu

NEG_SLOPE = 0.01  # PyTorch nn.LeakyReLU default


def wae_encoder_kernel(x_ref, w1_ref, b1_ref, w2_ref, b2_ref, o_ref):
    # fc1: Linear(121 -> 64).  K=121 is not lane-aligned; Mosaic zero-fills
    # the vreg tail so the contraction over the pad contributes 0.
    h = jnp.dot(x_ref[...], w1_ref[...], preferred_element_type=jnp.float32)
    h = h + b1_ref[...]                      # [1, 64] broadcasts over the tile
    h = jnp.where(h > 0, h, NEG_SLOPE * h)   # LeakyReLU, f32 epilogue

    # fc2: Linear(64 -> n_z).  n_z=32 store is masked (vst.msk) but hidden
    # under DMA on this mem-bound kernel; HBM writeback stays unpadded.
    z = jnp.dot(h.astype(w2_ref.dtype), w2_ref[...],
                preferred_element_type=jnp.float32)
    z = z + b2_ref[...]
    o_ref[...] = jnp.maximum(z, 0.0).astype(o_ref.dtype)


def _round_up(x, m):
    return (x + m - 1) // m * m


@functools.partial(jax.jit, static_argnames=("tile_b",))
def wae_encoder(x, w1, b1, w2, b2, *, tile_b=None):
    """x: [B,121]; w1: [121,64]; b1: [1,64] or [64]; w2: [64,n_z]; b2: [1,n_z] or [n_z]."""
    B, K = x.shape
    H = w1.shape[1]          # 64 hidden units
    n_z = w2.shape[1]

    if tile_b is None:
        # Biggest tile that still leaves >=2 grid steps (feeds both v7x TCs,
        # keeps the DMA pipeline primed on v5e/v6e), capped at 1024 rows.
        tile_b = min(1024, max(8, _round_up(pl.cdiv(B, 2), 8)))
    else:
        tile_b = max(8, min(tile_b, _round_up(B, 8)))

    # Biases are tiny; keep them f32 for the f32 epilogue.
    b1 = b1.reshape(1, H).astype(jnp.float32)
    b2 = b2.reshape(1, n_z).astype(jnp.float32)

    grid = (pl.cdiv(B, tile_b),)

    # True (unpadded) traffic + flops -- advisory for XLA scheduling.
    cost = pl.CostEstimate(
        flops=2 * B * (K * H + H * n_z),
        transcendentals=0,
        bytes_accessed=(B * K * x.dtype.itemsize
                        + K * H * w1.dtype.itemsize
                        + H * 4
                        + H * n_z * w2.dtype.itemsize
                        + n_z * 4
                        + B * n_z * 4),
    )

    return pl.pallas_call(
        wae_encoder_kernel,
        out_shape=jax.ShapeDtypeStruct((B, n_z), jnp.float32),
        grid=grid,
        in_specs=[
            pl.BlockSpec((tile_b, K), lambda i: (i, 0)),   # x tiles stream
            pl.BlockSpec((K, H), lambda i: (0, 0)),        # weights resident
            pl.BlockSpec((1, H), lambda i: (0, 0)),
            pl.BlockSpec((H, n_z), lambda i: (0, 0)),
            pl.BlockSpec((1, n_z), lambda i: (0, 0)),
        ],
        out_specs=pl.BlockSpec((tile_b, n_z), lambda i: (i, 0)),
        compiler_params=pltpu.CompilerParams(
            dimension_semantics=("parallel",),   # shard batch tiles across TCs
        ),
        cost_estimate=cost,
    )(x, w1, b1, w2, b2)


def init_params(key, n_z):
    """Deterministic synthetic parameters matching nn.Linear shapes."""
    k1, k2, k3, k4 = jax.random.split(key, 4)
    # PyTorch nn.Linear init: U(-1/sqrt(fan_in), 1/sqrt(fan_in))
    lim1 = 1.0 / jnp.sqrt(121.0)
    lim2 = 1.0 / jnp.sqrt(64.0)
    w1 = jax.random.uniform(k1, (121, 64), jnp.float32, -lim1, lim1)
    b1 = jax.random.uniform(k2, (1, 64), jnp.float32, -lim1, lim1)
    w2 = jax.random.uniform(k3, (64, n_z), jnp.float32, -lim2, lim2)
    b2 = jax.random.uniform(k4, (1, n_z), jnp.float32, -lim2, lim2)
    return w1, b1, w2, b2


def reference(x, w1, b1, w2, b2):
    h = x @ w1 + b1
    h = jnp.where(h > 0, h, NEG_SLOPE * h)
    z = h @ w2 + b2
    return jnp.maximum(z, 0.0)


if __name__ == "__main__":
    key = jax.random.PRNGKey(0)
    kx, kp = jax.random.split(key)

    B = 200        # not a multiple of the tile -> exercises partial last block
    n_z = 32       # args['n_z']

    x = jax.random.normal(kx, (B, 121), jnp.float32)
    w1, b1, w2, b2 = init_params(kp, n_z)
    ref = reference(x, w1, b1, w2, b2)

    # Default tile heuristic (>=2 grid steps, here tile_b=104 -> partial tail).
    out = jax.block_until_ready(wae_encoder(x, w1, b1, w2, b2))
    assert out.shape == (B, n_z)
    assert jnp.allclose(out, ref, atol=1e-5, rtol=1e-5)

    # Explicit smaller tile (grid=4, tail block of 8 rows).
    out2 = jax.block_until_ready(wae_encoder(x, w1, b1, w2, b2, tile_b=64))
    assert out2.shape == (B, n_z)
    assert jnp.allclose(out2, ref, atol=1e-5, rtol=1e-5)

    print("KERNEL_OK")
</pallas_src>

<mosaic_0001>
module attributes {stable_mosaic.version = 11 : i64} {
  func.func @wae_encoder_kernel(%arg0: i32, %arg1: memref<104x121xf32, #tpu.memory_space<vmem>>, %arg2: memref<121x64xf32, #tpu.memory_space<vmem>>, %arg3: memref<1x64xf32, #tpu.memory_space<vmem>>, %arg4: memref<64x32xf32, #tpu.memory_space<vmem>>, %arg5: memref<1x32xf32, #tpu.memory_space<vmem>>, %arg6: memref<104x32xf32, #tpu.memory_space<vmem>>) attributes {dimension_semantics = [#tpu.dimension_semantics<parallel>], iteration_bounds = array<i64: 2>, scalar_prefetch = 0 : i64, scratch_operands = 0 : i64, tpu.core_type = #tpu.core_type<tc>, window_params = [{transform_indices = @transform_0, window_bounds = array<i64: 104, 121>}, {pipeline_mode = #tpu.pipeline_mode<synchronous>, transform_indices = @transform_1, window_bounds = array<i64: 121, 64>}, {pipeline_mode = #tpu.pipeline_mode<synchronous>, transform_indices = @transform_2, window_bounds = array<i64: 1, 64>}, {pipeline_mode = #tpu.pipeline_mode<synchronous>, transform_indices = @transform_3, window_bounds = array<i64: 64, 32>}, {pipeline_mode = #tpu.pipeline_mode<synchronous>, transform_indices = @transform_4, window_bounds = array<i64: 1, 32>}, {transform_indices = @transform_5, window_bounds = array<i64: 104, 32>}]} {
    %c0 = arith.constant 0 : index
    %c0_0 = arith.constant 0 : index
    %0 = vector.load %arg1[%c0, %c0_0] : memref<104x121xf32, #tpu.memory_space<vmem>>, vector<104x121xf32>
    %c0_1 = arith.constant 0 : index
    %c0_2 = arith.constant 0 : index
    %1 = vector.load %arg2[%c0_1, %c0_2] : memref<121x64xf32, #tpu.memory_space<vmem>>, vector<121x64xf32>
    %cst = arith.constant dense<0.000000e+00> : vector<104x64xf32>
    %2 = tpu.matmul %0, %1, %cst {dimension_numbers = #tpu.dot_dimension_numbers<[1], [0], [0], [1], [0, 0, 1, 1], [], []>} : vector<104x121xf32>, vector<121x64xf32>, vector<104x64xf32> -> vector<104x64xf32>
    %c0_3 = arith.constant 0 : index
    %c0_4 = arith.constant 0 : index
    %3 = vector.load %arg3[%c0_3, %c0_4] : memref<1x64xf32, #tpu.memory_space<vmem>>, vector<1x64xf32>
    %4 = vector.broadcast %3 : vector<1x64xf32> to vector<104x64xf32>
    %5 = arith.addf %2, %4 : vector<104x64xf32>
    %cst_5 = arith.constant 0.000000e+00 : f32
    %6 = vector.broadcast %cst_5 : f32 to vector<104x64xf32>
    %7 = arith.cmpf ogt, %5, %6 : vector<104x64xf32>
    %cst_6 = arith.constant 0.00999999977 : f32
    %8 = vector.broadcast %cst_6 : f32 to vector<104x64xf32>
    %9 = arith.mulf %8, %5 : vector<104x64xf32>
    %10 = arith.select %7, %5, %9 : vector<104x64xi1>, vector<104x64xf32>
    %c0_7 = arith.constant 0 : index
    %c0_8 = arith.constant 0 : index
    %11 = vector.load %arg4[%c0_7, %c0_8] : memref<64x32xf32, #tpu.memory_space<vmem>>, vector<64x32xf32>
    %cst_9 = arith.constant dense<0.000000e+00> : vector<104x32xf32>
    %12 = tpu.matmul %10, %11, %cst_9 {dimension_numbers = #tpu.dot_dimension_numbers<[1], [0], [0], [1], [0, 0, 1, 1], [], []>} : vector<104x64xf32>, vector<64x32xf32>, vector<104x32xf32> -> vector<104x32xf32>
    %c0_10 = arith.constant 0 : index
    %c0_11 = arith.constant 0 : index
    %13 = vector.load %arg5[%c0_10, %c0_11] : memref<1x32xf32, #tpu.memory_space<vmem>>, vector<1x32xf32>
    %14 = vector.broadcast %13 : vector<1x32xf32> to vector<104x32xf32>
    %15 = arith.addf %12, %14 : vector<104x32xf32>
    %cst_12 = arith.constant 0.000000e+00 : f32
    %16 = vector.broadcast %cst_12 : f32 to vector<104x32xf32>
    %17 = arith.maximumf %15, %16 : vector<104x32xf32>
    %c0_13 = arith.constant 0 : index
    %c0_14 = arith.constant 0 : index
    %18 = vector.load %arg6[%c0_13, %c0_14] : memref<104x32xf32, #tpu.memory_space<vmem>>, vector<104x32xf32>
    tpu.vector_store %arg6[%c0_13, %c0_14], %17 {strides = array<i32>} : memref<104x32xf32, #tpu.memory_space<vmem>>, vector<104x32xf32>,
    return
  }
  func.func @transform_0(%arg0: i32) -> (i32, i32) {
    %c0_i32 = arith.constant 0 : i32
    %c0_i32_0 = arith.constant 0 : i32
    return %arg0, %c0_i32 : i32, i32
  }
  func.func @transform_1(%arg0: i32) -> (i32, i32) {
    %c0_i32 = arith.constant 0 : i32
    %c0_i32_0 = arith.constant 0 : i32
    %c0_i32_1 = arith.constant 0 : i32
    return %c0_i32, %c0_i32_0 : i32, i32
  }
  func.func @transform_2(%arg0: i32) -> (i32, i32) {
    %c0_i32 = arith.constant 0 : i32
    %c0_i32_0 = arith.constant 0 : i32
    %c0_i32_1 = arith.constant 0 : i32
    return %c0_i32, %c0_i32_0 : i32, i32
  }
  func.func @transform_3(%arg0: i32) -> (i32, i32) {
    %c0_i32 = arith.constant 0 : i32
    %c0_i32_0 = arith.constant 0 : i32
    %c0_i32_1 = arith.constant 0 : i32
    return %c0_i32, %c0_i32_0 : i32, i32
  }
  func.func @transform_4(%arg0: i32) -> (i32, i32) {
    %c0_i32 = arith.constant 0 : i32
    %c0_i32_0 = arith.constant 0 : i32
    %c0_i32_1 = arith.constant 0 : i32
    return %c0_i32, %c0_i32_0 : i32, i32
  }
  func.func @transform_5(%arg0: i32) -> (i32, i32) {
    %c0_i32 = arith.constant 0 : i32
    %c0_i32_0 = arith.constant 0 : i32
    return %arg0, %c0_i32 : i32, i32
  }
}

</mosaic_0001>

<bundles_post_ra>
// kernel: wae_encoder.1
= control target key start
LH: loop header
LB: loop body
LE: loop exit
PB: predicated region body
PF: predicated region fallthrough
CT: control target
= control target key end

     0   :  { %s1452_s18 = smov 0   ;;  %s1454_s19 = smov 0   ;;  %s1808_s0 = inlined_call_operand.vmem [shape: f32[200,121], index: 0, kind: input, shape index: {}]   ;;  %s1809_s1 = inlined_call_operand.vmem [shape: f32[121,64], index: 1, kind: input, shape index: {}]   ;;  %s1810_s2 = inlined_call_operand.vmem [shape: f32[1,64], index: 2, kind: input, shape index: {}]   ;;  %s1811_s3 = inlined_call_operand.vmem [shape: f32[64,32], index: 3, kind: input, shape index: {}]   ;;  %s1812_s4 = inlined_call_operand.vmem [shape: f32[1,32], index: 4, kind: input, shape index: {}]   ;;  %s1813_s5 = inlined_call_operand.vmem [shape: f32[200,32], index: 5, kind: output, shape index: {}]  }
   0x1   :  { %s1456_s20 = smov 0  }
   0x2 LB: > { %s1465_s21 = sadd.s32 4294967295, %s1384_s20   ;;  %s1467_s22 = sadd.s32 1, %s1384_s20   ;;  %s1384_s20 = sphi %s1456_s20, %s1820_s20   ;;  %s1380_s19 = sphi %s1454_s19, %s1819_s19   ;;  %s1376_s18 = sphi %s1452_s18, %s1818_s18  }
   0x3   : > { %s129_s23 = ssub.s32 %s1384_s20, %s1467_s22  ;;  %s132_s24 = sadd.s32 1, %s1380_s19 }
   0x4   : > { %p130_p0 = scmp.eq.s32.totalorder %s129_s23, 0  ;;  %p142_p1 = scmp.ne.s32.totalorder %s1380_s19, %s1376_s18 }
   0x5   : > { %p143_p2 = scmp.eq.s32.totalorder %s1465_s21, 1  ;;  %p975_p3 = scmp.ge.s32.totalorder %s1384_s20, 1 }
   0x6   : > { %s1475_s25 = scalar_select %p130_p0, %s1380_s19, %s132_s24  }
   0x7   : > { %p1477_p4 = por %p143_p2, %p142_p1  ;;  %p196_p5 = scmp.lt.s32.totalorder %s1384_s20, 3 }
   0x9   : > { %p197_p6 = pnand %p975_p3, %p196_p5 }
   0xa   : > { %v259_v0 = vld [vmem:[%s1809_s1] sm:$0xff] (!%p197_p6)  ;;  %v260_v1 = vld [vmem:[%s1809_s1 + $0x8] sm:$0xff] (!%p197_p6)  ;;  %v261_v2 = vld [vmem:[%s1809_s1 + $0x10] sm:$0xff] (!%p197_p6)  ;;  %v1418_v3 = vmov (!%p197_p6), 0.0|0.0   ;;  %vm1419_vm0 = vmmov (!%p197_p6), 0   ;;  %v1420_v6 = vmov (!%p197_p6), 0.0  }
   0xb   : > { %200 = sbr.rel (%p197_p6) target bundleno = 587 (0x24b), region = 40  ;;  %1195 = vmatprep.subr.bf16.mxu0 (!%p197_p6), %v1418_v3  ;;  %v1196_v4 = vpack.c.bf16 (!%p197_p6), %v260_v1, %v259_v0  ;;  %v262_v5 = vld [vmem:[%s1809_s1 + $0x18] sm:$0xff] (!%p197_p6)  ;;  %1220 = vmatprep.subr.bf16.mxu1 (!%p197_p6), %v1418_v3  ;;  %v263_v8 = vld [vmem:[%s1809_s1 + $0x20] sm:$0xff] (!%p197_p6)  ;;  %v264_v9 = vld [vmem:[%s1809_s1 + $0x28] sm:$0xff] (!%p197_p6)  ;;  %vm322_vm1 = vcmask (!%p197_p6), 1040384   ;;  %vm1421_vm2 = vmmov (!%p197_p6), 1  }
   0xc   : > { %1101 = vmatprep.mubr.msk.f32.mxu0 (!%p197_p6), %vm1419_vm0, %v1420_v6  ;;  %1156 = vmatprep.mubr.msk.f32.mxu1 (!%p197_p6), %vm1419_vm0, %v1420_v6  ;;  %v1199_v7 = vpack.c.bf16 (!%p197_p6), %v262_v5, %v261_v2  ;;  %v495_v10 = vld [vmem:[%s1811_s3] sm:$0xff] (!%p197_p6)  ;;  %v496_v11 = vld [vmem:[%s1811_s3 + $0x8] sm:$0xff] (!%p197_p6)  ;;  %v497_v12 = vld [vmem:[%s1811_s3 + $0x10] sm:$0xff] (!%p197_p6)  ;;  %v1202_v14 = vpack.c.bf16 (!%p197_p6), %v264_v9, %v263_v8  ;;  %s1534_s15 = smul.u32 (!%p197_p6), 13, %s1465_s21  ;;  %vm282_vm4 = vcmask (!%p197_p6), 990208   ;;  %vm510_vm6 = vcmask (!%p197_p6), 523264  }
   0xd   : > { %1197 = vmatpush3.bf16.msra.mxu0 (!%p197_p6), %v1196_v4  ;;  %v498_v13 = vld [vmem:[%s1811_s3 + $0x18] sm:$0xff] (!%p197_p6)  ;;  %v1221_v15 = vpack.c.bf16 (!%p197_p6), %v496_v11, %v495_v10  ;;  %v265_v16 = vld [vmem:[%s1809_s1 + $0x30] sm:$0xff] (!%p197_p6)  ;;  %v499_v19 = vld [vmem:[%s1811_s3 + $0x20] sm:$0xff] (!%p197_p6)  ;;  %s224_s27 = sand.u32 (!%p197_p6), 1, %s1376_s18  }
   0xe   : > { %1198 = vmatprep.subr.bf16.mxu0 (!%p197_p6), %v1418_v3  ;;  %v266_v17 = vld [vmem:[%s1809_s1 + $0x38] sm:$0xff] (!%p197_p6)  ;;  %v1224_v18 = vpack.c.bf16 (!%p197_p6), %v498_v13, %v497_v12  ;;  %v500_v20 = vld [vmem:[%s1811_s3 + $0x28] sm:$0xff] (!%p197_p6)  ;;  %v267_v22 = vld [vmem:[%s1809_s1 + $0x40] sm:$0xff] (!%p197_p6)  ;;  %p232_p7 = scmp.lt.s32.totalorder (!%p197_p6), %s1534_s15, 24  ;;  %s1232_s28 = smul.u32 (!%p197_p6), 104, %s224_s27 }
   0xf   : > { %1222 = vmatpush3.bf16.msra.mxu1 (!%p197_p6), %v1221_v15  ;;  %v1205_v21 = vpack.c.bf16 (!%p197_p6), %v266_v17, %v265_v16  ;;  %v268_v23 = vld [vmem:[%s1809_s1 + $0x48] sm:$0xff] (!%p197_p6)  ;;  %v1227_v24 = vpack.c.bf16 (!%p197_p6), %v500_v20, %v499_v19  ;;  %v269_v26 = vld [vmem:[%s1809_s1 + $0x50] sm:$0xff] (!%p197_p6)  ;;  %v270_v27 = vld [vmem:[%s1809_s1 + $0x58] sm:$0xff] (!%p197_p6) }
  0x10   : > { %1223 = vmatprep.subr.bf16.mxu1 (!%p197_p6), %v1418_v3  ;;  %v1208_v25 = vpack.c.bf16 (!%p197_p6), %v268_v23, %v267_v22  ;;  %v1211_v28 = vpack.c.bf16 (!%p197_p6), %v270_v27, %v269_v26  ;;  %v271_v29 = vld [vmem:[%s1809_s1 + $0x60] sm:$0xff] (!%p197_p6)  ;;  %v272_v30 = vld [vmem:[%s1809_s1 + $0x68] sm:$0xff] (!%p197_p6)  ;;  %v273_v32 = vld [vmem:[%s1809_s1 + $0x70] sm:$0xff] (!%p197_p6)  ;;  %s1679_s6 = scalar_lea.vmem (!%p197_p6), [#allocation2], %s1232_s28  }
  0x11   : > { %1200 = vmatpush3.bf16.msra.mxu0 (!%p197_p6), %v1199_v7  ;;  %v1214_v31 = vpack.c.bf16 (!%p197_p6), %v272_v30, %v271_v29  ;;  %v274_v33 = vld [vmem:[%s1809_s1 + $0x78] sm:$0x1] (!%p197_p6)  ;;  %vm1218_vm3 = vmpackc.low (!%p197_p6), %vm322_vm1, %vm1421_vm2  ;;  %v501_v48 = vld [vmem:[%s1811_s3 + $0x30] sm:$0xff] (!%p197_p6) }
  0x12   : > { %1201 = vmatprep.subr.bf16.mxu0 %v1418_v3  ;;  %s233_s30 = scalar_select %p232_p7, %s1534_s15, 24  ;;  %v1217_v34 = vpack.c.bf16 %v274_v33, %v273_v32  ;;  %v502_v49 = vld [vmem:[%s1811_s3 + $0x38] sm:$0xff]  ;;  %v1620_v51 = vld [vmem:[%s1810_s2] ss:$0 sm:$0xff] }
  0x13   : > { %1225 = vmatpush3.bf16.msra.mxu1 %v1224_v18  ;;  %v1230_v50 = vpack.c.bf16 %v502_v49, %v501_v48  ;;  %s715_s18 = ssub.s32 (%p1477_p4), 25, %s1534_s15  ;;  %s1018_s7 = smul.u32 (%p1477_p4), 104, %s1465_s21 }
  0x14   : > { %1226 = vmatprep.subr.bf16.mxu1 %v1418_v3  ;;  %s976_s10 = sshll.u32 %s233_s30, 3  ;;  %p716_p8 = scmp.lt.s32.totalorder (%p1477_p4), %s715_s18, 13 }
  0x15   : > { %1203 = vmatpush3.bf16.msra.mxu0 %v1202_v14  ;;  %s1559_s13 = scalar_lea.vmem %s1808_s0, %s976_s10  ;;  %s1726_s10 = scalar_lea.vmem (%p1477_p4), %s1813_s5, %s1018_s7  }
  0x16   : > { %1204 = vmatprep.subr.bf16.mxu0 %v1418_v3  ;;  %v246_v35 = vld [vmem:[%s1559_s13] sm:$0xff]  ;;  %v247_v36 = vld [vmem:[%s1559_s13 + $0x8] sm:$0xff]  ;;  %v248_v37 = vld [vmem:[%s1559_s13 + $0x10] sm:$0xff] }
  0x17   : > { %1228 = vmatpush3.bf16.msra.mxu1 %v1227_v24  ;;  %v249_v38 = vld [vmem:[%s1559_s13 + $0x18] sm:$0xff]  ;;  %v250_v39 = vld [vmem:[%s1559_s13 + $0x20] sm:$0xff]  ;;  %v251_v40 = vld [vmem:[%s1559_s13 + $0x28] sm:$0xff] }
  0x18   : > { %1229 = vmatprep.subr.bf16.mxu1 %v1418_v3  ;;  %v252_v41 = vld [vmem:[%s1559_s13 + $0x30] sm:$0xff]  ;;  %v253_v42 = vld [vmem:[%s1559_s13 + $0x38] sm:$0xff]  ;;  %v254_v43 = vld [vmem:[%s1559_s13 + $0x40] sm:$0xff] }
  0x19   : > { %1206 = vmatpush3.bf16.msra.mxu0 %v1205_v21  ;;  %v255_v44 = vld [vmem:[%s1559_s13 + $0x48] sm:$0xff]  ;;  %v256_v45 = vld [vmem:[%s1559_s13 + $0x50] sm:$0xff]  ;;  %v257_v46 = vld [vmem:[%s1559_s13 + $0x58] sm:$0xff] }
  0x1a   : > { %1207 = vmatprep.subr.bf16.mxu0 %v1418_v3  ;;  %v258_v47 = vld [vmem:[%s1559_s13 + $0x60] sm:$0xff] }
  0x1b   : > { %1231 = vmatpush3.bf16.msra.mxu1 %v1230_v50 }
  0x1d   : > { %1209 = vmatpush3.bf16.msra.mxu0 %v1208_v25 }
  0x1e   : > { %1210 = vmatprep.subr.bf16.mxu0 %v1418_v3 }
  0x21   : > { %1212 = vmatpush3.bf16.msra.mxu0 %v1211_v28 }
  0x22   : > { %1213 = vmatprep.subr.bf16.mxu0 %v1418_v3 }
  0x25   : > { %1215 = vmatpush3.bf16.msra.mxu0 %v1214_v31 }
  0x26   : > { %1216 = vmatprep.subr.bf16.mxu0 %v1418_v3 }
  0x29   : > { %1219 = vmatpush3.bf16.msk.msra.mxu0 %vm1218_vm3, %v1217_v34 }
  0x2c   : > { %1102 = vmatmul.mubr.msk.f32.vlgmr.msra.gmra.mrb[0].mxu0 %vm282_vm4, %v246_v35 }
  0x2d   : > { %1104 = vmatprep.mubr.msk.f32.mxu0 %vm1419_vm0, %v1420_v6 }
  0x30   : > { %1105 = vmatmul.mubr.msk.f32.gmra.mrb[2].mxu0 %vm282_vm4, %v247_v36 }
  0x31   : > { %1107 = vmatprep.mubr.msk.f32.mxu0 %vm1419_vm0, %v1420_v6 }
  0x34   : > { %1108 = vmatmul.mubr.msk.f32.gmra.mrb[4].mxu0 %vm282_vm4, %v248_v37 }
  0x35   : > { %1110 = vmatprep.mubr.msk.f32.mxu0 %vm1419_vm0, %v1420_v6 }
  0x38   : > { %1111 = vmatmul.mubr.msk.f32.gmra.mrb[6].mxu0 %vm282_vm4, %v249_v38 }
  0x39   : > { %1113 = vmatprep.mubr.msk.f32.mxu0 %vm1419_vm0, %v1420_v6 }
  0x3c   : > { %1114 = vmatmul.mubr.msk.f32.gmra.mrb[8].mxu0 %vm282_vm4, %v250_v39 }
  0x3d   : > { %1116 = vmatprep.mubr.msk.f32.mxu0 %vm1419_vm0, %v1420_v6 }
  0x40   : > { %1117 = vmatmul.mubr.msk.f32.gmra.mrb[10].mxu0 %vm282_vm4, %v251_v40 }
  0x41   : > { %1119 = vmatprep.mubr.msk.f32.mxu0 %vm1419_vm0, %v1420_v6 }
  0x44   : > { %1120 = vmatmul.mubr.msk.f32.gmra.mrb[12].mxu0 %vm282_vm4, %v252_v41 }
  0x45   : > { %1122 = vmatprep.mubr.msk.f32.mxu0 %vm1419_vm0, %v1420_v6 }
  0x48   : > { %1123 = vmatmul.mubr.msk.f32.gmra.mrb[14].mxu0 %vm282_vm4, %v253_v42 }
  0x49   : > { %1125 = vmatprep.mubr.msk.f32.mxu0 %vm1419_vm0, %v1420_v6 }
  0x4c   : > { %1126 = vmatmul.mubr.msk.f32.gmra.mrb[16].mxu0 %vm282_vm4, %v254_v43 }
  0x4d   : > { %1128 = vmatprep.mubr.msk.f32.mxu0 %vm1419_vm0, %v1420_v6 }
  0x50   : > { %1129 = vmatmul.mubr.msk.f32.gmra.mrb[18].mxu0 %vm282_vm4, %v255_v44 }
  0x51   : > { %1131 = vmatprep.mubr.msk.f32.mxu0 %vm1419_vm0, %v1420_v6 }
  0x54   : > { %1132 = vmatmul.mubr.msk.f32.gmra.mrb[20].mxu0 %vm282_vm4, %v256_v45 }
  0x55   : > { %1134 = vmatprep.mubr.msk.f32.mxu0 %vm1419_vm0, %v1420_v6 }
  0x58   : > { %1135 = vmatmul.mubr.msk.f32.gmra.mrb[22].mxu0 %vm282_vm4, %v257_v46 }
  0x59   : > { %1137 = vmatprep.mubr.msk.f32.mxu0 %vm1419_vm0, %v1420_v6 }
  0x5c   : > { %1138 = vmatmul.mubr.msk.f32.gmra.mrb[24].mxu0 %vm282_vm4, %v258_v47  ;;  %vm693_vm4 = vcmask 261120  }
  0xff   : > { %v392_v52 = vpop.f32.mrb[0].mxu0 }
 0x100   : > { %v393_v53 = vadd.f32 %v1620_v51, %v392_v52  ;;  %v1103_v54 = vpop.f32.mrb[1].mxu0 }
 0x102   : > { %vm456_vm5 = vcmp.gt.f32.partialorder %v393_v53, 0.0  ;;  %v469_v55 = vmul.f32 0.01, %v393_v53 }
 0x103   : > { %v397_v56 = vpop.f32.mrb[2].mxu0 }
 0x104   : > { %v398_v57 = vadd.f32 %v1620_v51, %v397_v56  ;;  %v1106_v58 = vpop.f32.mrb[3].mxu0  ;;  %v482_v59 = vsel %vm456_vm5, %v393_v53, %v469_v55  ;;  %v1676_v55 = vld [vmem:[%s1812_s4] ss:$0 sm:$0xff] }
 0x105   : > { %1157 = vmatmul.mubr.msk.f32.vlgmr.msra.gmra.mrb[0].mxu1 %vm510_vm6, %v482_v59 }
 0x106   : > { %vm457_vm7 = vcmp.gt.f32.partialorder %v398_v57, 0.0  ;;  %v470_v60 = vmul.f32 0.01, %v398_v57  ;;  %1159 = vmatprep.mubr.msk.f32.mxu1 %vm1419_vm0, %v1420_v6 }
 0x107   : > { %v402_v61 = vpop.f32.mrb[4].mxu0 }
 0x108   : > { %v403_v62 = vadd.f32 %v1620_v51, %v402_v61  ;;  %v1109_v63 = vpop.f32.mrb[5].mxu0  ;;  %v483_v0 = vsel %vm457_vm7, %v398_v57, %v470_v60 }
 0x109   : > { %1160 = vmatmul.mubr.msk.f32.gmra.mrb[2].mxu1 %vm510_vm6, %v483_v0 }
 0x10a   : > { %vm458_vm8 = vcmp.gt.f32.partialorder %v403_v62, 0.0  ;;  %v471_v1 = vmul.f32 0.01, %v403_v62  ;;  %1162 = vmatprep.mubr.msk.f32.mxu1 %vm1419_vm0, %v1420_v6 }
 0x10b   : > { %v407_v2 = vpop.f32.mrb[6].mxu0 }
 0x10c   : > { %v408_v3 = vadd.f32 %v1620_v51, %v407_v2  ;;  %v1112_v4 = vpop.f32.mrb[7].mxu0  ;;  %v484_v5 = vsel %vm458_vm8, %v403_v62, %v471_v1 }
 0x10d   : > { %1163 = vmatmul.mubr.msk.f32.gmra.mrb[4].mxu1 %vm510_vm6, %v484_v5 }
 0x10e   : > { %vm459_vm9 = vcmp.gt.f32.partialorder %v408_v3, 0.0  ;;  %v472_v7 = vmul.f32 0.01, %v408_v3  ;;  %1165 = vmatprep.mubr.msk.f32.mxu1 %vm1419_vm0, %v1420_v6 }
 0x10f   : > { %v412_v8 = vpop.f32.mrb[8].mxu0 }
 0x110   : > { %v413_v9 = vadd.f32 %v1620_v51, %v412_v8  ;;  %v1115_v10 = vpop.f32.mrb[9].mxu0  ;;  %v485_v11 = vsel %vm459_vm9, %v408_v3, %v472_v7 }
 0x111   : > { %1166 = vmatmul.mubr.msk.f32.gmra.mrb[6].mxu1 %vm510_vm6, %v485_v11 }
 0x112   : > { %vm460_vm10 = vcmp.gt.f32.partialorder %v413_v9, 0.0  ;;  %v473_v12 = vmul.f32 0.01, %v413_v9  ;;  %1168 = vmatprep.mubr.msk.f32.mxu1 %vm1419_vm0, %v1420_v6 }
 0x113   : > { %v417_v13 = vpop.f32.mrb[10].mxu0 }
 0x114   : > { %v418_v14 = vadd.f32 %v1620_v51, %v417_v13  ;;  %v1118_v15 = vpop.f32.mrb[11].mxu0  ;;  %v486_v16 = vsel %vm460_vm10, %v413_v9, %v473_v12 }
 0x115   : > { %1169 = vmatmul.mubr.msk.f32.gmra.mrb[8].mxu1 %vm510_vm6, %v486_v16 }
 0x116   : > { %vm461_vm11 = vcmp.gt.f32.partialorder %v418_v14, 0.0  ;;  %v474_v17 = vmul.f32 0.01, %v418_v14  ;;  %1171 = vmatprep.mubr.msk.f32.mxu1 %vm1419_vm0, %v1420_v6 }
 0x117   : > { %v422_v18 = vpop.f32.mrb[12].mxu0 }
 0x118   : > { %v423_v19 = vadd.f32 %v1620_v51, %v422_v18  ;;  %v1121_v20 = vpop.f32.mrb[13].mxu0  ;;  %v487_v21 = vsel %vm461_vm11, %v418_v14, %v474_v17 }
 0x119   : > { %1172 = vmatmul.mubr.msk.f32.gmra.mrb[10].mxu1 %vm510_vm6, %v487_v21 }
 0x11a   : > { %vm462_vm12 = vcmp.gt.f32.partialorder %v423_v19, 0.0  ;;  %v475_v22 = vmul.f32 0.01, %v423_v19  ;;  %1174 = vmatprep.mubr.msk.f32.mxu1 %vm1419_vm0, %v1420_v6 }
 0x11b   : > { %v427_v23 = vpop.f32.mrb[14].mxu0 }
 0x11c   : > { %v428_v24 = vadd.f32 %v1620_v51, %v427_v23  ;;  %v1124_v25 = vpop.f32.mrb[15].mxu0  ;;  %v488_v26 = vsel %vm462_vm12, %v423_v19, %v475_v22 }
 0x11d   : > { %1175 = vmatmul.mubr.msk.f32.gmra.mrb[12].mxu1 %vm510_vm6, %v488_v26 }
 0x11e   : > { %vm463_vm13 = vcmp.gt.f32.partialorder %v428_v24, 0.0  ;;  %v476_v27 = vmul.f32 0.01, %v428_v24  ;;  %1177 = vmatprep.mubr.msk.f32.mxu1 %vm1419_vm0, %v1420_v6 }
 0x11f   : > { %v432_v28 = vpop.f32.mrb[16].mxu0 }
 0x120   : > { %v433_v29 = vadd.f32 %v1620_v51, %v432_v28  ;;  %v1127_v30 = vpop.f32.mrb[17].mxu0  ;;  %v489_v31 = vsel %vm463_vm13, %v428_v24, %v476_v27 }
 0x121   : > { %1178 = vmatmul.mubr.msk.f32.gmra.mrb[14].mxu1 %vm510_vm6, %v489_v31 }
 0x122   : > { %vm464_vm14 = vcmp.gt.f32.partialorder %v433_v29, 0.0  ;;  %v477_v32 = vmul.f32 0.01, %v433_v29  ;;  %1180 = vmatprep.mubr.msk.f32.mxu1 %vm1419_vm0, %v1420_v6 }
 0x123   : > { %v437_v33 = vpop.f32.mrb[18].mxu0 }
 0x124   : > { %v438_v34 = vadd.f32 %v1620_v51, %v437_v33  ;;  %v1130_v35 = vpop.f32.mrb[19].mxu0  ;;  %v490_v36 = vsel %vm464_vm14, %v433_v29, %v477_v32 }
 0x125   : > { %1181 = vmatmul.mubr.msk.f32.gmra.mrb[16].mxu1 %vm510_vm6, %v490_v36 }
 0x126   : > { %vm465_vm15 = vcmp.gt.f32.partialorder %v438_v34, 0.0  ;;  %v478_v37 = vmul.f32 0.01, %v438_v34  ;;  %1183 = vmatprep.mubr.msk.f32.mxu1 %vm1419_vm0, %v1420_v6 }
 0x127   : > { %v442_v38 = vpop.f32.mrb[20].mxu0 }
 0x128   : > { %v443_v39 = vadd.f32 %v1620_v51, %v442_v38  ;;  %v1133_v40 = vpop.f32.mrb[21].mxu0  ;;  %v491_v41 = vsel %vm465_vm15, %v438_v34, %v478_v37 }
 0x129   : > { %1184 = vmatmul.mubr.msk.f32.gmra.mrb[18].mxu1 %vm510_vm6, %v491_v41 }
 0x12a   : > { %vm466_vm1 = vcmp.gt.f32.partialorder %v443_v39, 0.0  ;;  %v479_v42 = vmul.f32 0.01, %v443_v39  ;;  %1186 = vmatprep.mubr.msk.f32.mxu1 %vm1419_vm0, %v1420_v6 }
 0x12b   : > { %v447_v43 = vpop.f32.mrb[22].mxu0 }
 0x12c   : > { %v448_v44 = vadd.f32 %v1620_v51, %v447_v43  ;;  %v1136_v45 = vpop.f32.mrb[23].mxu0  ;;  %v492_v46 = vsel %vm466_vm1, %v443_v39, %v479_v42 }
 0x12d   : > { %1187 = vmatmul.mubr.msk.f32.gmra.mrb[20].mxu1 %vm510_vm6, %v492_v46 }
 0x12e   : > { %vm467_vm2 = vcmp.gt.f32.partialorder %v448_v44, 0.0  ;;  %v480_v47 = vmul.f32 0.01, %v448_v44  ;;  %1189 = vmatprep.mubr.msk.f32.mxu1 %vm1419_vm0, %v1420_v6 }
 0x12f   : > { %v452_v48 = vpop.f32.mrb[24].mxu0 }
 0x130   : > { %v453_v49 = vadd.f32 %v1620_v51, %v452_v48  ;;  %v1139_v50 = vpop.f32.mrb[25].mxu0  ;;  %v493_v52 = vsel %vm467_vm2, %v448_v44, %v480_v47 }
 0x131   : > { %1190 = vmatmul.mubr.msk.f32.gmra.mrb[22].mxu1 %vm510_vm6, %v493_v52 }
 0x132   : > { %vm468_vm3 = vcmp.gt.f32.partialorder %v453_v49, 0.0  ;;  %v481_v53 = vmul.f32 0.01, %v453_v49  ;;  %1192 = vmatprep.mubr.msk.f32.mxu1 %vm1419_vm0, %v1420_v6 }
 0x134   : > { %v494_v54 = vsel %vm468_vm3, %v453_v49, %v481_v53 }
 0x135   : > { %1193 = vmatmul.mubr.msk.f32.gmra.mrb[24].mxu1 %vm510_vm6, %v494_v54 }
 0x1d8   : > { %v616_v51 = vpop.f32.mrb[0].mxu1 }
 0x1d9   : > { %v617_v56 = vadd.f32 %v1676_v55, %v616_v51  ;;  %v1158_v57 = vpop.f32.mrb[1].mxu1 }
 0x1db   : > { %v680_v58 = vmax.f32 %v617_v56, 0.0 }
 0x1dc   : > { %v621_v59 = vpop.f32.mrb[2].mxu1 }
 0x1dd   : > { %694 = vst.msk [vmem:[%s1679_s6] sm:$0xff] %vm693_vm4, %v680_v58  ;;  %v622_v6 = vadd.f32 %v1676_v55, %v621_v59  ;;  %v1161_v60 = vpop.f32.mrb[3].mxu1 }
 0x1df   : > { %v681_v61 = vmax.f32 %v622_v6, 0.0 }
 0x1e0   : > { %v626_v62 = vpop.f32.mrb[4].mxu1 }
 0x1e1   : > { %695 = vst.msk [vmem:[%s1679_s6 + $0x8] sm:$0xff] %vm693_vm4, %v681_v61  ;;  %v627_v63 = vadd.f32 %v1676_v55, %v626_v62  ;;  %v1164_v0 = vpop.f32.mrb[5].mxu1 }
 0x1e3   : > { %v682_v1 = vmax.f32 %v627_v63, 0.0 }
 0x1e4   : > { %v631_v2 = vpop.f32.mrb[6].mxu1 }
 0x1e5   : > { %696 = vst.msk [vmem:[%s1679_s6 + $0x10] sm:$0xff] %vm693_vm4, %v682_v1  ;;  %v632_v3 = vadd.f32 %v1676_v55, %v631_v2  ;;  %v1167_v4 = vpop.f32.mrb[7].mxu1 }
 0x1e7   : > { %v683_v5 = vmax.f32 %v632_v3, 0.0 }
 0x1e8   : > { %v636_v7 = vpop.f32.mrb[8].mxu1 }
 0x1e9   : > { %697 = vst.msk [vmem:[%s1679_s6 + $0x18] sm:$0xff] %vm693_vm4, %v683_v5  ;;  %v637_v8 = vadd.f32 %v1676_v55, %v636_v7  ;;  %v1170_v9 = vpop.f32.mrb[9].mxu1 }
 0x1eb   : > { %v684_v10 = vmax.f32 %v637_v8, 0.0 }
 0x1ec   : > { %v641_v11 = vpop.f32.mrb[10].mxu1 }
 0x1ed   : > { %698 = vst.msk [vmem:[%s1679_s6 + $0x20] sm:$0xff] %vm693_vm4, %v684_v10  ;;  %v642_v12 = vadd.f32 %v1676_v55, %v641_v11  ;;  %v1173_v13 = vpop.f32.mrb[11].mxu1 }
 0x1ef   : > { %v685_v14 = vmax.f32 %v642_v12, 0.0 }
 0x1f0   : > { %v646_v15 = vpop.f32.mrb[12].mxu1 }
 0x1f1   : > { %699 = vst.msk [vmem:[%s1679_s6 + $0x28] sm:$0xff] %vm693_vm4, %v685_v14  ;;  %v647_v16 = vadd.f32 %v1676_v55, %v646_v15  ;;  %v1176_v17 = vpop.f32.mrb[13].mxu1 }
 0x1f3   : > { %v686_v18 = vmax.f32 %v647_v16, 0.0 }
 0x1f4   : > { %v651_v19 = vpop.f32.mrb[14].mxu1 }
 0x1f5   : > { %700 = vst.msk [vmem:[%s1679_s6 + $0x30] sm:$0xff] %vm693_vm4, %v686_v18  ;;  %v652_v20 = vadd.f32 %v1676_v55, %v651_v19  ;;  %v1179_v21 = vpop.f32.mrb[15].mxu1 }
 0x1f7   : > { %v687_v22 = vmax.f32 %v652_v20, 0.0 }
 0x1f8   : > { %v656_v23 = vpop.f32.mrb[16].mxu1 }
 0x1f9   : > { %701 = vst.msk [vmem:[%s1679_s6 + $0x38] sm:$0xff] %vm693_vm4, %v687_v22  ;;  %v657_v24 = vadd.f32 %v1676_v55, %v656_v23  ;;  %v1182_v25 = vpop.f32.mrb[17].mxu1 }
 0x1fb   : > { %v688_v26 = vmax.f32 %v657_v24, 0.0 }
 0x1fc   : > { %v661_v27 = vpop.f32.mrb[18].mxu1 }
 0x1fd   : > { %702 = vst.msk [vmem:[%s1679_s6 + $0x40] sm:$0xff] %vm693_vm4, %v688_v26  ;;  %v662_v28 = vadd.f32 %v1676_v55, %v661_v27  ;;  %v1185_v29 = vpop.f32.mrb[19].mxu1 }
 0x1ff   : > { %v689_v30 = vmax.f32 %v662_v28, 0.0 }
 0x200   : > { %v666_v31 = vpop.f32.mrb[20].mxu1 }
 0x201   : > { %703 = vst.msk [vmem:[%s1679_s6 + $0x48] sm:$0xff] %vm693_vm4, %v689_v30  ;;  %v667_v32 = vadd.f32 %v1676_v55, %v666_v31  ;;  %v1188_v33 = vpop.f32.mrb[21].mxu1 }
 0x203   : > { %v690_v34 = vmax.f32 %v667_v32, 0.0 }
 0x204   : > { %v671_v35 = vpop.f32.mrb[22].mxu1 }
 0x205   : > { %704 = vst.msk [vmem:[%s1679_s6 + $0x50] sm:$0xff] %vm693_vm4, %v690_v34  ;;  %v672_v36 = vadd.f32 %v1676_v55, %v671_v35  ;;  %v1191_v37 = vpop.f32.mrb[23].mxu1 }
 0x207   : > { %v691_v38 = vmax.f32 %v672_v36, 0.0  ;;  %713 = sbr.rel (!%p1477_p4) target bundleno = 587 (0x24b), region = 44 }
 0x208   : > { %v676_v39 = vpop.f32.mrb[24].mxu1 }
 0x209   : > { %705 = vst.msk [vmem:[%s1679_s6 + $0x58] sm:$0xff] %vm693_vm4, %v691_v38  ;;  %v677_v40 = vadd.f32 %v1676_v55, %v676_v39  ;;  %v1194_v41 = vpop.f32.mrb[25].mxu1 }
 0x20b   : > { %v692_v42 = vmax.f32 %v677_v40, 0.0 }
 0x20d   : > { %706 = vst.msk [vmem:[%s1679_s6 + $0x60] sm:$0xff] %vm693_vm4, %v692_v42 }
 0x20e   : > { %s1822_s18 = smov (!%p716_p8, %s715_s18), 13 }
 0x20f   : > { %s1006_s11 = sshll.u32 %s1822_s18, 7 }
 0x210   : > { %p1009_p9 = scmp.eq.s32.totalorder %s1006_s11, 0 }
 0x211   : > { %1326 = sdivrem.u32 (!%p1009_p9), %s1822_s18, 13 }
 0x212   : > { %724 = sbr.rel (%p1009_p9) target bundleno = 587 (0x24b), region = 48 }
 0x21a   : > { %s1732_s26 = spop.drf %1326 }
 0x21b   : > { %p1010_p10 = scmp.le.s32.totalorder %s1732_s26, 0 }
 0x21c   : > { %s1815_s21 = smov (!%p1010_p10), %s1726_s10  ;;  %s1816_s15 = smov (!%p1010_p10), %s1679_s6 }
 0x21d   : > { %928 = sbr.rel (%p1010_p10) target bundleno = 558 (0x22e), region = 124  ;;  %s1741_s12 = smov (!%p1010_p10), 0  }
 0x21e   : > { %s1743_s13 = smov (!%p1010_p10), 0  }
 0x224 LB: >> { %v812_v43 = vld [vmem:[%s1392_s15] sm:$0xff]  ;;  %v814_v44 = vld [vmem:[%s1392_s15 + $0x8] sm:$0xff]  ;;  %v816_v45 = vld [vmem:[%s1392_s15 + $0x10] sm:$0xff]  ;;  %s838_s14 = sadd.s32 1, %s1396_s12  ;;  %s806_s13 = sadd.s32 1, %s1400_s13   ;;  %s1400_s13 = sphi %s1743_s13, %s806_s13   ;;  %s1396_s12 = sphi %s1741_s12, %s1817_s12   ;;  %s1392_s15 = sphi %s1816_s15, %s843_s15   ;;  %s1388_s21 = sphi %s1815_s21, %s844_s21  }
 0x225   : >> { %813 = vst [vmem:[%s1388_s21] sm:$0xff] %v812_v43  ;;  %815 = vst [vmem:[%s1388_s21 + $0x8] sm:$0xff] %v814_v44  ;;  %v818_v46 = vld [vmem:[%s1392_s15 + $0x18] sm:$0xff]  ;;  %v820_v47 = vld [vmem:[%s1392_s15 + $0x20] sm:$0xff]  ;;  %p839_p11 = scmp.ge.s32.totalorder %s838_s14, %s1732_s26  ;;  %p805_p12 = scmp.ge.s32.totalorder %s806_s13, %s1732_s26 }
 0x226   : >> { %817 = vst [vmem:[%s1388_s21 + $0x10] sm:$0xff] %v816_v45  ;;  %v822_v48 = vld [vmem:[%s1392_s15 + $0x28] sm:$0xff]  ;;  %819 = vst [vmem:[%s1388_s21 + $0x18] sm:$0xff] %v818_v46  ;;  %v824_v49 = vld [vmem:[%s1392_s15 + $0x30] sm:$0xff] }
 0x227   : >> { %821 = vst [vmem:[%s1388_s21 + $0x20] sm:$0xff] %v820_v47  ;;  %823 = vst [vmem:[%s1388_s21 + $0x28] sm:$0xff] %v822_v48  ;;  %v826_v50 = vld [vmem:[%s1392_s15 + $0x38] sm:$0xff]  ;;  %v828_v52 = vld [vmem:[%s1392_s15 + $0x40] sm:$0xff]  ;;  %s1824_s14 = smov (%p839_p11, %s838_s14), 0  ;;  %808 = sbr.rel (!%p805_p12) target bundleno = 548 (0x224), region = 130 }
 0x228   : >> { %825 = vst [vmem:[%s1388_s21 + $0x30] sm:$0xff] %v824_v49  ;;  %827 = vst [vmem:[%s1388_s21 + $0x38] sm:$0xff] %v826_v50  ;;  %v830_v53 = vld [vmem:[%s1392_s15 + $0x48] sm:$0xff]  ;;  %v832_v54 = vld [vmem:[%s1392_s15 + $0x50] sm:$0xff]  ;;  %s841_s16 = smul.u32 104, %s1824_s14  ;;  %s1817_s12 = smov %s1824_s14 }
 0x229   : >> { %829 = vst [vmem:[%s1388_s21 + $0x40] sm:$0xff] %v828_v52  ;;  %v834_v55 = vld [vmem:[%s1392_s15 + $0x58] sm:$0xff]  ;;  %831 = vst [vmem:[%s1388_s21 + $0x48] sm:$0xff] %v830_v53  ;;  %v836_v51 = vld [vmem:[%s1392_s15 + $0x60] sm:$0xff] }
 0x22a   : >> { %833 = vst [vmem:[%s1388_s21 + $0x50] sm:$0xff] %v832_v54  ;;  %835 = vst [vmem:[%s1388_s21 + $0x58] sm:$0xff] %v834_v55  ;;  %s843_s15 = scalar_lea.vmem %s1679_s6, %s841_s16 [#allocation2]  }
 0x22b   : >> { %837 = vst [vmem:[%s1388_s21 + $0x60] sm:$0xff] %v836_v51  ;;  %s844_s21 = scalar_lea.vmem %s1726_s10, %s841_s16  }
 0x22e PF: > { %1328 = sdivrem.u32 %s1822_s18, 13 }
 0x22f   : > { %s1011_s17 = smul.u32 104, %s1732_s26 }
 0x231   : > { %s849_s20 = scalar_lea.vmem %s1679_s6, %s1011_s17 [#allocation2]   ;;  %s851_s23 = scalar_lea.vmem %s1726_s10, %s1011_s17  }
 0x237   : > { %s1329_s24 = spop.drf %1328 }
 0x238   : > { %p1013_p13 = scmp.le.s32.totalorder %s1329_s24, 0 }
 0x239   : > { %s1402_s27 = smov (!%p1013_p13), %s851_s23   ;;  %s1406_s28 = smov (!%p1013_p13), %s849_s20  }
 0x23a   : > { %942 = sbr.rel (%p1013_p13) target bundleno = 587 (0x24b), region = 135  ;;  %s1410_s29 = smov (!%p1013_p13), 0  }
 0x23b   : > { %s1414_s30 = smov (!%p1013_p13), 0  }
 0x241 LB: >> { %v861_v56 = vld [vmem:[%s1408_s28] sm:$0xff]  ;;  %s863_s7 = sadd.s32 1, %s1412_s29  ;;  %s855_s30 = sadd.s32 1, %s1416_s30   ;;  %s1416_s30 = sphi %s1414_s30, %s855_s30   ;;  %s1412_s29 = sphi %s1410_s29, %s1411_s29   ;;  %s1408_s28 = sphi %s1406_s28, %s868_s28   ;;  %s1404_s27 = sphi %s1402_s27, %s869_s27  }
 0x242   : >> { %862 = vst [vmem:[%s1404_s27] sm:$0xff] %v861_v56  ;;  %p864_p0 = scmp.ge.s32.totalorder %s863_s7, %s1329_s24  ;;  %p854_p1 = scmp.ge.s32.totalorder %s855_s30, %s1329_s24 }
 0x244   : >> { %s1826_s7 = smov (%p864_p0, %s863_s7), 0  ;;  %857 = sbr.rel (!%p854_p1) target bundleno = 577 (0x241), region = 141 }
 0x245   : >> { %s1014_s6 = sshll.u32 %s1826_s7, 3  ;;  %s1411_s29 = smov %s1826_s7  }
 0x246   : >> { %s868_s28 = scalar_lea.vmem %s849_s20, %s1014_s6 [#allocation2]   ;;  %s869_s27 = scalar_lea.vmem %s851_s23, %s1014_s6  }
 0x24b PF: > { %p12_p2 = scmp.ge.s32.totalorder %s1467_s22, 4   ;;  %s1818_s18 = smov %s1380_s19 }
 0x24c   : > { %s1819_s19 = smov %s1475_s25  ;;  %s1820_s20 = smov %s1467_s22 }
 0x24d   :  { %14 = sbr.rel (!%p12_p2) target bundleno = 2 (0x2), region = 152 }

</bundles_post_ra>
